<compile_context>
chip_gen: v7x
topology: tpu7x:2x2x1
jax: 0.10.0
libtpu: 0.0.40
codegen_flags: <defaults>
</compile_context>

<pallas_src>
import functools

import jax
import jax.numpy as jnp
from jax.experimental import pallas as pl
from jax.experimental.pallas import tpu as pltpu


def _round_up(x: int, m: int) -> int:
    return ((x + m - 1) // m) * m


def _sublane_rows(dtype) -> int:
    """Dtype-aware sublane multiple: 8 rows for 4-byte, 16 for 2-byte, 32 for 1-byte."""
    return max(8, 32 // jnp.dtype(dtype).itemsize)


def _num_tensorcores() -> int:
    """Best-effort detection of TensorCores-per-chip (v7x / megacore chips have 2)."""
    try:
        kind = jax.devices()[0].device_kind.lower()
    except Exception:  # pragma: no cover
        return 1
    if "v7" in kind or "tpu7" in kind or "v4" in kind or "v5p" in kind:
        return 2
    return 1


def _make_mlp_kernel(num_layers: int):
    """Fused MLP kernel: num_layers * relu(x@W+b) followed by a final linear.

    The StochasticDepth scale p is already folded into the hidden-layer
    weights/biases at parameter-preparation time, so the hot loop has no extra
    VPU multiply.
    """

    def kernel(*refs):
        # refs = (x, w0, b0, ..., w_{L-1}, b_{L-1}, wf, bf, out)
        x_ref = refs[0]
        o_ref = refs[-1]

        h = x_ref[...]                                     # native dtype operands
        idx = 1
        for _ in range(num_layers):
            w = refs[idx][...]
            b = refs[idx + 1][...]
            idx += 2
            acc = jnp.dot(h, w, preferred_element_type=jnp.float32)
            acc = acc + b.astype(jnp.float32)
            # Intentional: keep inter-layer operands in the input dtype (no-op for f32).
            h = jnp.maximum(acc, 0.0).astype(x_ref.dtype)
        wf = refs[idx][...]
        bf = refs[idx + 1][...]
        out = jnp.dot(h, wf, preferred_element_type=jnp.float32)
        out = out + bf.astype(jnp.float32)
        o_ref[...] = out.astype(o_ref.dtype)

    return kernel


def prepare_params(weights, biases, *, p: float = 0.5, lane_pad: int = 128):
    """One-time parameter prep (do NOT call per forward).

    - Transpose PyTorch [out, in] weights to [in, out].
    - Fold the StochasticDepth scale p into every hidden layer's W and b.
      Valid only because relu(p*z) == p*relu(z) requires p >= 0 (module enforces
      0 < p < 1; asserted here).
    - Zero-pad the final layer's output dim up to a multiple of `lane_pad` so
      kernel output stores are lane-dense (pass lane_pad=1 for an unpadded,
      masked-store output variant — a measured trade-off at large batch on v5e).
    Returns (flat_params_tuple, num_labels).
    """
    assert p > 0.0, "p-folding into hidden layers requires p > 0 (relu homogeneity)"
    n = len(weights)
    flat = []
    for i, (w, b) in enumerate(zip(weights, biases)):
        wt = jnp.transpose(w)              # [in, out]
        b2 = b.reshape(1, -1)              # [1, out]
        if i < n - 1:
            wt = p * wt
            b2 = p * b2
        else:
            out_f = wt.shape[1]
            pad = (-out_f) % max(lane_pad, 1)
            if pad:
                wt = jnp.pad(wt, ((0, 0), (0, pad)))
                b2 = jnp.pad(b2, ((0, 0), (0, pad)))
        flat.append(wt)
        flat.append(b2)
    return tuple(flat), weights[-1].shape[0]


@functools.partial(
    jax.jit, static_argnames=("num_layers", "num_labels", "tile_m")
)
def linear_noisy_forward(x, flat_params, *, num_layers: int, num_labels: int,
                         tile_m: int = 1024):
    """
    x:           [batch, emb_size]
    flat_params: output of prepare_params() — (W0,b0,...,Wf,bf) with W [in,out],
                 b [1,out], p folded into hidden layers, final layer lane-padded.
    Returns:     [batch, num_labels]
    """
    batch, emb = x.shape
    padded_labels = flat_params[-1].shape[-1]

    sub = _sublane_rows(x.dtype)            # dtype-aware sublane rounding
    num_tc = _num_tensorcores()             # 2 on v7x / megacore, else 1

    # ---- Batch tiling: fewest, largest tiles (one per TensorCore for small batch).
    SMALL_BATCH_PER_TC = 2048
    if batch <= SMALL_BATCH_PER_TC * num_tc:
        # One tile per TensorCore: grid=1 on v5e/v6e, grid=2 "parallel" on v7x.
        tm = _round_up(pl.cdiv(batch, num_tc), sub)
    else:
        # Large batch: big tiles (>=512 rows) to amortize per-grid-step overhead.
        tm = _round_up(max(tile_m, 512), sub)
    padded_batch = _round_up(batch, tm)
    if padded_batch != batch:
        x = jnp.pad(x, ((0, padded_batch - batch), (0, 0)))

    grid = (padded_batch // tm,)

    kernel = _make_mlp_kernel(num_layers)

    in_specs = [pl.BlockSpec((tm, emb), lambda i: (i, 0))]
    for a in flat_params:
        # Full-array blocks with a constant index_map: weights/biases stay
        # resident in VMEM across all batch tiles.
        in_specs.append(pl.BlockSpec(a.shape, lambda i: (0, 0)))
    out_spec = pl.BlockSpec((tm, padded_labels), lambda i: (i, 0))

    itemsize = x.dtype.itemsize
    param_bytes = sum(int(a.size) * a.dtype.itemsize for a in flat_params)

    # Explicit scoped-VMEM budget (v5e defaults to only 16 MiB; v7x has 64 MiB
    # physical). x/out blocks are double-buffered by the pipeline; assume the
    # constant param blocks are too (worst case), plus generous headroom.
    needed = 2 * (tm * emb + tm * padded_labels) * itemsize + 2 * param_bytes
    vmem_limit = int(min(max(needed + (4 << 20), 32 << 20), 48 << 20))

    # Advisory cost estimate for XLA's scheduler.
    flops = 0
    for li in range(num_layers + 1):
        w = flat_params[2 * li]
        flops += 2 * padded_batch * w.shape[0] * w.shape[1]
    bytes_accessed = (
        x.size * itemsize + param_bytes + padded_batch * padded_labels * itemsize
    )
    cost = pl.CostEstimate(
        flops=flops, transcendentals=0, bytes_accessed=bytes_accessed
    )

    out = pl.pallas_call(
        kernel,
        out_shape=jax.ShapeDtypeStruct((padded_batch, padded_labels), x.dtype),
        grid_spec=pl.GridSpec(grid=grid, in_specs=in_specs, out_specs=out_spec),
        compiler_params=pltpu.CompilerParams(
            dimension_semantics=("parallel",),
            vmem_limit_bytes=vmem_limit,
        ),
        cost_estimate=cost,
    )(x, *flat_params)

    # Only slice when padding was actually introduced (identity otherwise).
    # TODO(synk): at very large batch, consumers should take the padded array
    # directly (or fuse this slice) to avoid an extra HBM pass over the output.
    if padded_batch != batch or padded_labels != num_labels:
        out = out[:batch, :num_labels]
    return out


def _reference_forward(x, weights, biases, num_layers, p=0.5):
    h = x.astype(jnp.float32)
    for i in range(num_layers):
        h = jnp.maximum(p * (h @ weights[i].T + biases[i]), 0.0)
    return (h @ weights[-1].T + biases[-1]).astype(x.dtype)


if __name__ == "__main__":
    # Module configuration (consistent with Linear_Noisy.__init__).
    emb_size = 32
    hidden_size = 32
    num_layers = 2
    num_labels = 8
    batch = 200          # exercises the single-tile (or 2-tile on v7x) path
    p = 0.5

    key = jax.random.PRNGKey(0)
    keys = jax.random.split(key, 2 * (num_layers + 1) + 1)

    # Deterministic parameter init (PyTorch nn.Linear shapes: W [out, in], b [out]).
    weights, biases = [], []
    k_i = 0
    in_f = emb_size
    for i in range(num_layers):
        weights.append(
            0.1 * jax.random.normal(keys[k_i], (hidden_size, in_f), jnp.float32)
        )
        k_i += 1
        biases.append(
            0.1 * jax.random.normal(keys[k_i], (hidden_size,), jnp.float32)
        )
        k_i += 1
        in_f = hidden_size
    final_in = hidden_size if num_layers > 0 else emb_size
    weights.append(
        0.1 * jax.random.normal(keys[k_i], (num_labels, final_in), jnp.float32)
    )
    k_i += 1
    biases.append(
        0.1 * jax.random.normal(keys[k_i], (num_labels,), jnp.float32)
    )
    k_i += 1

    x = jax.random.normal(keys[k_i], (batch, emb_size), jnp.float32)

    # One-time parameter preparation (transpose, p-fold, lane-pad).
    flat_params, n_lab = prepare_params(weights, biases, p=p)

    out = linear_noisy_forward(
        x, flat_params, num_layers=num_layers, num_labels=n_lab
    )
    out = jax.block_until_ready(out)

    ref = _reference_forward(x, weights, biases, num_layers, p)
    assert out.shape == (batch, num_labels), out.shape
    assert jnp.allclose(out, ref, atol=1e-5, rtol=1e-5), (
        f"max abs err = {jnp.max(jnp.abs(out - ref))}"
    )

    print("KERNEL_OK")
</pallas_src>

<mosaic_0001>
module attributes {stable_mosaic.version = 11 : i64} {
  func.func @kernel(%arg0: i32, %arg1: memref<200x32xf32, #tpu.memory_space<vmem>>, %arg2: memref<32x32xf32, #tpu.memory_space<vmem>>, %arg3: memref<1x32xf32, #tpu.memory_space<vmem>>, %arg4: memref<32x32xf32, #tpu.memory_space<vmem>>, %arg5: memref<1x32xf32, #tpu.memory_space<vmem>>, %arg6: memref<32x128xf32, #tpu.memory_space<vmem>>, %arg7: memref<1x128xf32, #tpu.memory_space<vmem>>, %arg8: memref<200x128xf32, #tpu.memory_space<vmem>>) attributes {dimension_semantics = [#tpu.dimension_semantics<parallel>], iteration_bounds = array<i64: 1>, scalar_prefetch = 0 : i64, scratch_operands = 0 : i64, tpu.core_type = #tpu.core_type<tc>, window_params = [{transform_indices = @transform_0, window_bounds = array<i64: 200, 32>}, {pipeline_mode = #tpu.pipeline_mode<synchronous>, transform_indices = @transform_1, window_bounds = array<i64: 32, 32>}, {pipeline_mode = #tpu.pipeline_mode<synchronous>, transform_indices = @transform_2, window_bounds = array<i64: 1, 32>}, {pipeline_mode = #tpu.pipeline_mode<synchronous>, transform_indices = @transform_3, window_bounds = array<i64: 32, 32>}, {pipeline_mode = #tpu.pipeline_mode<synchronous>, transform_indices = @transform_4, window_bounds = array<i64: 1, 32>}, {pipeline_mode = #tpu.pipeline_mode<synchronous>, transform_indices = @transform_5, window_bounds = array<i64: 32, 128>}, {pipeline_mode = #tpu.pipeline_mode<synchronous>, transform_indices = @transform_6, window_bounds = array<i64: 1, 128>}, {transform_indices = @transform_7, window_bounds = array<i64: 200, 128>}]} {
    %c0 = arith.constant 0 : index
    %c0_0 = arith.constant 0 : index
    %0 = vector.load %arg1[%c0, %c0_0] : memref<200x32xf32, #tpu.memory_space<vmem>>, vector<200x32xf32>
    %c0_1 = arith.constant 0 : index
    %c0_2 = arith.constant 0 : index
    %1 = vector.load %arg2[%c0_1, %c0_2] : memref<32x32xf32, #tpu.memory_space<vmem>>, vector<32x32xf32>
    %c0_3 = arith.constant 0 : index
    %c0_4 = arith.constant 0 : index
    %2 = vector.load %arg3[%c0_3, %c0_4] : memref<1x32xf32, #tpu.memory_space<vmem>>, vector<1x32xf32>
    %cst = arith.constant dense<0.000000e+00> : vector<200x32xf32>
    %3 = tpu.matmul %0, %1, %cst {dimension_numbers = #tpu.dot_dimension_numbers<[1], [0], [0], [1], [0, 0, 1, 1], [], []>} : vector<200x32xf32>, vector<32x32xf32>, vector<200x32xf32> -> vector<200x32xf32>
    %4 = vector.broadcast %2 : vector<1x32xf32> to vector<200x32xf32>
    %5 = arith.addf %3, %4 : vector<200x32xf32>
    %cst_5 = arith.constant 0.000000e+00 : f32
    %6 = vector.broadcast %cst_5 : f32 to vector<200x32xf32>
    %7 = arith.maximumf %5, %6 : vector<200x32xf32>
    %c0_6 = arith.constant 0 : index
    %c0_7 = arith.constant 0 : index
    %8 = vector.load %arg4[%c0_6, %c0_7] : memref<32x32xf32, #tpu.memory_space<vmem>>, vector<32x32xf32>
    %c0_8 = arith.constant 0 : index
    %c0_9 = arith.constant 0 : index
    %9 = vector.load %arg5[%c0_8, %c0_9] : memref<1x32xf32, #tpu.memory_space<vmem>>, vector<1x32xf32>
    %cst_10 = arith.constant dense<0.000000e+00> : vector<200x32xf32>
    %10 = tpu.matmul %7, %8, %cst_10 {dimension_numbers = #tpu.dot_dimension_numbers<[1], [0], [0], [1], [0, 0, 1, 1], [], []>} : vector<200x32xf32>, vector<32x32xf32>, vector<200x32xf32> -> vector<200x32xf32>
    %11 = vector.broadcast %9 : vector<1x32xf32> to vector<200x32xf32>
    %12 = arith.addf %10, %11 : vector<200x32xf32>
    %cst_11 = arith.constant 0.000000e+00 : f32
    %13 = vector.broadcast %cst_11 : f32 to vector<200x32xf32>
    %14 = arith.maximumf %12, %13 : vector<200x32xf32>
    %c0_12 = arith.constant 0 : index
    %c0_13 = arith.constant 0 : index
    %15 = vector.load %arg6[%c0_12, %c0_13] : memref<32x128xf32, #tpu.memory_space<vmem>>, vector<32x128xf32>
    %c0_14 = arith.constant 0 : index
    %c0_15 = arith.constant 0 : index
    %16 = vector.load %arg7[%c0_14, %c0_15] : memref<1x128xf32, #tpu.memory_space<vmem>>, vector<1x128xf32>
    %cst_16 = arith.constant dense<0.000000e+00> : vector<200x128xf32>
    %17 = tpu.matmul %14, %15, %cst_16 {dimension_numbers = #tpu.dot_dimension_numbers<[1], [0], [0], [1], [0, 0, 1, 1], [], []>} : vector<200x32xf32>, vector<32x128xf32>, vector<200x128xf32> -> vector<200x128xf32>
    %18 = vector.broadcast %16 : vector<1x128xf32> to vector<200x128xf32>
    %19 = arith.addf %17, %18 : vector<200x128xf32>
    %c0_17 = arith.constant 0 : index
    %c0_18 = arith.constant 0 : index
    %20 = vector.load %arg8[%c0_17, %c0_18] : memref<200x128xf32, #tpu.memory_space<vmem>>, vector<200x128xf32>
    tpu.vector_store %arg8[%c0_17, %c0_18], %19 {strides = array<i32>} : memref<200x128xf32, #tpu.memory_space<vmem>>, vector<200x128xf32>,
    return
  }
  func.func @transform_0(%arg0: i32) -> (i32, i32) {
    %c0_i32 = arith.constant 0 : i32
    %c0_i32_0 = arith.constant 0 : i32
    return %arg0, %c0_i32 : i32, i32
  }
  func.func @transform_1(%arg0: i32) -> (i32, i32) {
    %c0_i32 = arith.constant 0 : i32
    %c0_i32_0 = arith.constant 0 : i32
    %c0_i32_1 = arith.constant 0 : i32
    return %c0_i32, %c0_i32_0 : i32, i32
  }
  func.func @transform_2(%arg0: i32) -> (i32, i32) {
    %c0_i32 = arith.constant 0 : i32
    %c0_i32_0 = arith.constant 0 : i32
    %c0_i32_1 = arith.constant 0 : i32
    return %c0_i32, %c0_i32_0 : i32, i32
  }
  func.func @transform_3(%arg0: i32) -> (i32, i32) {
    %c0_i32 = arith.constant 0 : i32
    %c0_i32_0 = arith.constant 0 : i32
    %c0_i32_1 = arith.constant 0 : i32
    return %c0_i32, %c0_i32_0 : i32, i32
  }
  func.func @transform_4(%arg0: i32) -> (i32, i32) {
    %c0_i32 = arith.constant 0 : i32
    %c0_i32_0 = arith.constant 0 : i32
    %c0_i32_1 = arith.constant 0 : i32
    return %c0_i32, %c0_i32_0 : i32, i32
  }
  func.func @transform_5(%arg0: i32) -> (i32, i32) {
    %c0_i32 = arith.constant 0 : i32
    %c0_i32_0 = arith.constant 0 : i32
    %c0_i32_1 = arith.constant 0 : i32
    return %c0_i32, %c0_i32_0 : i32, i32
  }
  func.func @transform_6(%arg0: i32) -> (i32, i32) {
    %c0_i32 = arith.constant 0 : i32
    %c0_i32_0 = arith.constant 0 : i32
    %c0_i32_1 = arith.constant 0 : i32
    return %c0_i32, %c0_i32_0 : i32, i32
  }
  func.func @transform_7(%arg0: i32) -> (i32, i32) {
    %c0_i32 = arith.constant 0 : i32
    %c0_i32_0 = arith.constant 0 : i32
    return %arg0, %c0_i32 : i32, i32
  }
}

</mosaic_0001>

<bundles_post_ra>
// kernel: linear_noisy_forward.1
= control target key start
LH: loop header
LB: loop body
LE: loop exit
PB: predicated region body
PF: predicated region fallthrough
CT: control target
= control target key end

     0   :  { %v1398_v0 = vmov 0.0|0.0   ;;  %vm1399_vm0 = vmmov 0   ;;  %v1400_v4 = vmov 0.0   ;;  %vm62_vm1 = vcmask 261120   ;;  %s1980_s1 = inlined_call_operand.vmem [shape: f32[32,32], index: 1, kind: input, shape index: {}]   ;;  %s1981_s0 = inlined_call_operand.vmem [shape: f32[200,32], index: 0, kind: input, shape index: {}]   ;;  %s1982_s3 = inlined_call_operand.vmem [shape: f32[32,32], index: 3, kind: input, shape index: {}]   ;;  %s1983_s5 = inlined_call_operand.vmem [shape: f32[32,128], index: 5, kind: input, shape index: {}]   ;;  %s1984_s2 = inlined_call_operand.vmem [shape: f32[1,32], index: 2, kind: input, shape index: {}]   ;;  %s1985_s4 = inlined_call_operand.vmem [shape: f32[1,32], index: 4, kind: input, shape index: {}]   ;;  %s1986_s6 = inlined_call_operand.vmem [shape: f32[1,128], index: 6, kind: input, shape index: {}]   ;;  %s1987_s7 = inlined_call_operand.vmem [shape: f32[200,128], index: 7, kind: output, shape index: {}]  }
   0x1   :  { %1373 = vmatprep.subr.bf16.mxu0 %v1398_v0  ;;  %v51_v1 = vld [vmem:[%s1980_s1] sm:$0xff]  ;;  %v52_v2 = vld [vmem:[%s1980_s1 + $0x8] sm:$0xff]  ;;  %v53_v3 = vld [vmem:[%s1980_s1 + $0x10] sm:$0xff]  ;;  %1132 = vmatprep.mubr.msk.f32.mxu0 %vm1399_vm0, %v1400_v4 }
   0x2   :  { %v1374_v5 = vpack.c.bf16 %v52_v2, %v51_v1  ;;  %v54_v6 = vld [vmem:[%s1980_s1 + $0x18] sm:$0xff]  ;;  %1391 = vmatprep.subr.bf16.mxu1 %v1398_v0  ;;  %1171 = vmatprep.mubr.msk.f32.mxu1 %vm1399_vm0, %v1400_v4  ;;  %v26_v8 = vld [vmem:[%s1981_s0] sm:$0xff]  ;;  %v39_v9 = vld [vmem:[%s1981_s0 + $0x68] sm:$0xff] }
   0x3   :  { %v1377_v7 = vpack.c.bf16 %v54_v6, %v53_v3  ;;  %v353_v10 = vld [vmem:[%s1982_s3] sm:$0xff]  ;;  %v354_v11 = vld [vmem:[%s1982_s3 + $0x8] sm:$0xff]  ;;  %v355_v12 = vld [vmem:[%s1982_s3 + $0x10] sm:$0xff] }
   0x4   :  { %1375 = vmatpush3.bf16.msra.mxu0 %v1374_v5  ;;  %1393 = vmatpush3.bf16.msra.mxu1 %v1374_v5  ;;  %v356_v13 = vld [vmem:[%s1982_s3 + $0x18] sm:$0xff]  ;;  %v27_v14 = vld [vmem:[%s1981_s0 + $0x8] sm:$0xff]  ;;  %v40_v15 = vld [vmem:[%s1981_s0 + $0x70] sm:$0xff]  ;;  %v1380_v16 = vpack.c.bf16 %v354_v11, %v353_v10 }
   0x5   :  { %1376 = vmatprep.subr.bf16.mxu0 %v1398_v0  ;;  %1392 = vmatprep.subr.bf16.mxu1 %v1398_v0  ;;  %v1383_v17 = vpack.c.bf16 %v356_v13, %v355_v12  ;;  %v28_v18 = vld [vmem:[%s1981_s0 + $0x10] sm:$0xff]  ;;  %v41_v19 = vld [vmem:[%s1981_s0 + $0x78] sm:$0xff]  ;;  %v42_v21 = vld [vmem:[%s1981_s0 + $0x80] sm:$0xff] }
   0x6   :  { %v29_v20 = vld [vmem:[%s1981_s0 + $0x18] sm:$0xff]  ;;  %v30_v22 = vld [vmem:[%s1981_s0 + $0x20] sm:$0xff]  ;;  %v43_v23 = vld [vmem:[%s1981_s0 + $0x88] sm:$0xff] }
   0x7   :  { %v31_v24 = vld [vmem:[%s1981_s0 + $0x28] sm:$0xff]  ;;  %v44_v25 = vld [vmem:[%s1981_s0 + $0x90] sm:$0xff]  ;;  %v45_v27 = vld [vmem:[%s1981_s0 + $0x98] sm:$0xff] }
   0x8   :  { %1378 = vmatpush3.bf16.msra.mxu0 %v1377_v7  ;;  %1394 = vmatpush3.bf16.msra.mxu1 %v1377_v7  ;;  %v32_v26 = vld [vmem:[%s1981_s0 + $0x30] sm:$0xff]  ;;  %v33_v28 = vld [vmem:[%s1981_s0 + $0x38] sm:$0xff]  ;;  %v46_v29 = vld [vmem:[%s1981_s0 + $0xa0] sm:$0xff] }
   0x9   :  { %1379 = vmatprep.subr.bf16.mxu1 %v1398_v0  ;;  %1385 = vmatprep.subr.bf16.mxu0 %v1398_v0  ;;  %v34_v30 = vld [vmem:[%s1981_s0 + $0x40] sm:$0xff]  ;;  %v47_v31 = vld [vmem:[%s1981_s0 + $0xa8] sm:$0xff]  ;;  %v48_v33 = vld [vmem:[%s1981_s0 + $0xb0] sm:$0xff] }
   0xa   :  { %v35_v32 = vld [vmem:[%s1981_s0 + $0x48] sm:$0xff]  ;;  %v36_v34 = vld [vmem:[%s1981_s0 + $0x50] sm:$0xff]  ;;  %v49_v35 = vld [vmem:[%s1981_s0 + $0xb8] sm:$0xff] }
   0xb   :  { %1133 = vmatmul.mubr.msk.f32.vlgmr.msra.gmra.mrb[0].mxu0 %vm62_vm1, %v26_v8  ;;  %1172 = vmatmul.mubr.msk.f32.vlgmr.msra.gmra.mrb[0].mxu1 %vm62_vm1, %v39_v9  ;;  %v37_v36 = vld [vmem:[%s1981_s0 + $0x58] sm:$0xff]  ;;  %v50_v37 = vld [vmem:[%s1981_s0 + $0xc0] sm:$0xff]  ;;  %v655_v40 = vld [vmem:[%s1983_s5 + $0x8] sm:$0xff] }
   0xc   :  { %1135 = vmatprep.mubr.msk.f32.mxu0 %vm1399_vm0, %v1400_v4  ;;  %1174 = vmatprep.mubr.msk.f32.mxu1 %vm1399_vm0, %v1400_v4  ;;  %v38_v38 = vld [vmem:[%s1981_s0 + $0x60] sm:$0xff]  ;;  %v656_v41 = vld [vmem:[%s1983_s5 + $0x10] sm:$0xff]  ;;  %v657_v43 = vld [vmem:[%s1983_s5 + $0x18] sm:$0xff] }
   0xd   :  { %1381 = vmatpush3.bf16.msra.mxu1 %v1380_v16  ;;  %v654_v39 = vld [vmem:[%s1983_s5] sm:$0xff]  ;;  %v1389_v44 = vpack.c.bf16 %v657_v43, %v656_v41 }
   0xe   :  { %1382 = vmatprep.subr.bf16.mxu1 %v1398_v0  ;;  %v1386_v42 = vpack.c.bf16 %v655_v40, %v654_v39  ;;  %v1642_v45 = vld [vmem:[%s1984_s2] ss:$0 sm:$0xff] }
   0xf   :  { %1136 = vmatmul.mubr.msk.f32.gmra.mrb[2].mxu0 %vm62_vm1, %v27_v14  ;;  %1175 = vmatmul.mubr.msk.f32.gmra.mrb[2].mxu1 %vm62_vm1, %v40_v15 }
  0x10   :  { %1138 = vmatprep.mubr.msk.f32.mxu0 %vm1399_vm0, %v1400_v4  ;;  %1177 = vmatprep.mubr.msk.f32.mxu1 %vm1399_vm0, %v1400_v4 }
  0x11   :  { %1384 = vmatpush3.bf16.msra.mxu1 %v1383_v17  ;;  %1387 = vmatpush3.bf16.msra.mxu0 %v1386_v42 }
  0x12   :  { %1388 = vmatprep.subr.bf16.mxu0 %v1398_v0 }
  0x13   :  { %1139 = vmatmul.mubr.msk.f32.gmra.mrb[4].mxu0 %vm62_vm1, %v28_v18  ;;  %1178 = vmatmul.mubr.msk.f32.gmra.mrb[4].mxu1 %vm62_vm1, %v41_v19 }
  0x14   :  { %1141 = vmatprep.mubr.msk.f32.mxu0 %vm1399_vm0, %v1400_v4  ;;  %1180 = vmatprep.mubr.msk.f32.mxu1 %vm1399_vm0, %v1400_v4 }
  0x15   :  { %1390 = vmatpush3.bf16.msra.mxu0 %v1389_v44 }
  0x17   :  { %1142 = vmatmul.mubr.msk.f32.gmra.mrb[6].mxu0 %vm62_vm1, %v29_v20  ;;  %1181 = vmatmul.mubr.msk.f32.gmra.mrb[6].mxu1 %vm62_vm1, %v42_v21 }
  0x18   :  { %1144 = vmatprep.mubr.msk.f32.mxu0 %vm1399_vm0, %v1400_v4  ;;  %1183 = vmatprep.mubr.msk.f32.mxu1 %vm1399_vm0, %v1400_v4 }
  0x1b   :  { %1145 = vmatmul.mubr.msk.f32.gmra.mrb[8].mxu0 %vm62_vm1, %v30_v22  ;;  %1184 = vmatmul.mubr.msk.f32.gmra.mrb[8].mxu1 %vm62_vm1, %v43_v23 }
  0x1c   :  { %1147 = vmatprep.mubr.msk.f32.mxu0 %vm1399_vm0, %v1400_v4  ;;  %1186 = vmatprep.mubr.msk.f32.mxu1 %vm1399_vm0, %v1400_v4 }
  0x1f   :  { %1148 = vmatmul.mubr.msk.f32.gmra.mrb[10].mxu0 %vm62_vm1, %v31_v24  ;;  %1187 = vmatmul.mubr.msk.f32.gmra.mrb[10].mxu1 %vm62_vm1, %v44_v25 }
  0x20   :  { %1150 = vmatprep.mubr.msk.f32.mxu0 %vm1399_vm0, %v1400_v4  ;;  %1189 = vmatprep.mubr.msk.f32.mxu1 %vm1399_vm0, %v1400_v4 }
  0x23   :  { %1151 = vmatmul.mubr.msk.f32.gmra.mrb[12].mxu0 %vm62_vm1, %v32_v26  ;;  %1190 = vmatmul.mubr.msk.f32.gmra.mrb[12].mxu1 %vm62_vm1, %v45_v27 }
  0x24   :  { %1153 = vmatprep.mubr.msk.f32.mxu0 %vm1399_vm0, %v1400_v4  ;;  %1192 = vmatprep.mubr.msk.f32.mxu1 %vm1399_vm0, %v1400_v4 }
  0x27   :  { %1154 = vmatmul.mubr.msk.f32.gmra.mrb[14].mxu0 %vm62_vm1, %v33_v28  ;;  %1193 = vmatmul.mubr.msk.f32.gmra.mrb[14].mxu1 %vm62_vm1, %v46_v29 }
  0x28   :  { %1156 = vmatprep.mubr.msk.f32.mxu0 %vm1399_vm0, %v1400_v4  ;;  %1195 = vmatprep.mubr.msk.f32.mxu1 %vm1399_vm0, %v1400_v4 }
  0x2b   :  { %1157 = vmatmul.mubr.msk.f32.gmra.mrb[16].mxu0 %vm62_vm1, %v34_v30  ;;  %1196 = vmatmul.mubr.msk.f32.gmra.mrb[16].mxu1 %vm62_vm1, %v47_v31 }
  0x2c   :  { %1159 = vmatprep.mubr.msk.f32.mxu0 %vm1399_vm0, %v1400_v4  ;;  %1198 = vmatprep.mubr.msk.f32.mxu1 %vm1399_vm0, %v1400_v4 }
  0x2f   :  { %1160 = vmatmul.mubr.msk.f32.gmra.mrb[18].mxu0 %vm62_vm1, %v35_v32  ;;  %1199 = vmatmul.mubr.msk.f32.gmra.mrb[18].mxu1 %vm62_vm1, %v48_v33 }
  0x30   :  { %1162 = vmatprep.mubr.msk.f32.mxu0 %vm1399_vm0, %v1400_v4  ;;  %1201 = vmatprep.mubr.msk.f32.mxu1 %vm1399_vm0, %v1400_v4 }
  0x33   :  { %1163 = vmatmul.mubr.msk.f32.gmra.mrb[20].mxu0 %vm62_vm1, %v36_v34  ;;  %1202 = vmatmul.mubr.msk.f32.gmra.mrb[20].mxu1 %vm62_vm1, %v49_v35 }
  0x34   :  { %1165 = vmatprep.mubr.msk.f32.mxu0 %vm1399_vm0, %v1400_v4  ;;  %1204 = vmatprep.mubr.msk.f32.mxu1 %vm1399_vm0, %v1400_v4 }
  0x37   :  { %1166 = vmatmul.mubr.msk.f32.gmra.mrb[22].mxu0 %vm62_vm1, %v37_v36  ;;  %1205 = vmatmul.mubr.msk.f32.gmra.mrb[22].mxu1 %vm62_vm1, %v50_v37 }
  0x38   :  { %1168 = vmatprep.mubr.msk.f32.mxu0 %vm1399_vm0, %v1400_v4  ;;  %1215 = vmatprep.mubr.msk.f32.mxu1 %vm1399_vm0, %v1400_v4 }
  0x3b   :  { %1169 = vmatmul.mubr.msk.f32.gmra.mrb[24].mxu0 %vm62_vm1, %v38_v38 }
  0x3c   :  { %1298 = vmatprep.mubr.msk.f32.mxu0 %vm1399_vm0, %v1400_v4 }
  0xde   :  { %v204_v46 = vpop.f32.mrb[0].mxu0  ;;  %v1644_v47 = vpop.f32.mrb[0].mxu1 }
  0xdf   :  { %v205_v48 = vadd.f32 %v1642_v45, %v204_v46  ;;  %v1134_v49 = vpop.f32.mrb[1].mxu0  ;;  %v1173_v50 = vpop.f32.mrb[1].mxu1 }
  0xe1   :  { %v328_v51 = vmax.f32 %v205_v48, 0.0 }
  0xe2   :  { %v209_v52 = vpop.f32.mrb[2].mxu0  ;;  %v1647_v53 = vpop.f32.mrb[2].mxu1 }
  0xe3   :  { %v210_v54 = vadd.f32 %v1642_v45, %v209_v52  ;;  %v1137_v55 = vpop.f32.mrb[3].mxu0  ;;  %1216 = vmatmul.mubr.msk.f32.vlgmr.msra.gmra.mrb[24].mxu1 %vm62_vm1, %v328_v51  ;;  %v1176_v56 = vpop.f32.mrb[3].mxu1 }
  0xe4   :  { %1218 = vmatprep.mubr.msk.f32.mxu1 %vm1399_vm0, %v1400_v4 }
  0xe5   :  { %v329_v57 = vmax.f32 %v210_v54, 0.0 }
  0xe6   :  { %v214_v58 = vpop.f32.mrb[4].mxu0  ;;  %v1653_v59 = vpop.f32.mrb[4].mxu1 }
  0xe7   :  { %v215_v60 = vadd.f32 %v1642_v45, %v214_v58  ;;  %v1140_v61 = vpop.f32.mrb[5].mxu0  ;;  %1219 = vmatmul.mubr.msk.f32.gmra.mrb[26].mxu1 %vm62_vm1, %v329_v57  ;;  %v1179_v62 = vpop.f32.mrb[5].mxu1 }
  0xe8   :  { %1221 = vmatprep.mubr.msk.f32.mxu1 %vm1399_vm0, %v1400_v4 }
  0xe9   :  { %v330_v63 = vmax.f32 %v215_v60, 0.0 }
  0xea   :  { %v219_v0 = vpop.f32.mrb[6].mxu0  ;;  %v284_v1 = vpop.f32.mrb[6].mxu1 }
  0xeb   :  { %v220_v2 = vadd.f32 %v1642_v45, %v219_v0  ;;  %v1143_v3 = vpop.f32.mrb[7].mxu0  ;;  %1222 = vmatmul.mubr.msk.f32.gmra.mrb[28].mxu1 %vm62_vm1, %v330_v63  ;;  %v1662_v5 = vadd.f32 %v1642_v45, %v284_v1  ;;  %v1182_v6 = vpop.f32.mrb[7].mxu1 }
  0xec   :  { %1224 = vmatprep.mubr.msk.f32.mxu1 %vm1399_vm0, %v1400_v4 }
  0xed   :  { %v331_v7 = vmax.f32 %v220_v2, 0.0 }
  0xee   :  { %v224_v8 = vpop.f32.mrb[8].mxu0  ;;  %v289_v9 = vpop.f32.mrb[8].mxu1 }
  0xef   :  { %v225_v10 = vadd.f32 %v1642_v45, %v224_v8  ;;  %v1146_v11 = vpop.f32.mrb[9].mxu0  ;;  %1225 = vmatmul.mubr.msk.f32.gmra.mrb[30].mxu1 %vm62_vm1, %v331_v7  ;;  %v1669_v12 = vadd.f32 %v1642_v45, %v289_v9  ;;  %v1185_v13 = vpop.f32.mrb[9].mxu1  ;;  %v270_v9 = vadd.f32 %v1642_v45, %v1644_v47 }
  0xf0   :  { %1227 = vmatprep.mubr.msk.f32.mxu1 %vm1399_vm0, %v1400_v4  ;;  %v275_v13 = vadd.f32 %v1642_v45, %v1647_v53  ;;  %v344_v53 = vmax.f32 %v1662_v5, 0.0 }
  0xf1   :  { %v332_v14 = vmax.f32 %v225_v10, 0.0  ;;  %v341_v11 = vmax.f32 %v270_v9, 0.0 }
  0xf2   :  { %v229_v15 = vpop.f32.mrb[10].mxu0  ;;  %v294_v16 = vpop.f32.mrb[10].mxu1 }
  0xf3   :  { %v230_v17 = vadd.f32 %v1642_v45, %v229_v15  ;;  %v1149_v18 = vpop.f32.mrb[11].mxu0  ;;  %1228 = vmatmul.mubr.msk.f32.gmra.mrb[32].mxu1 %vm62_vm1, %v332_v14  ;;  %v1676_v19 = vadd.f32 %v1642_v45, %v294_v16  ;;  %v1188_v20 = vpop.f32.mrb[11].mxu1  ;;  %v342_v14 = vmax.f32 %v275_v13, 0.0  ;;  %v280_v15 = vadd.f32 %v1642_v45, %v1653_v59 }
  0xf4   :  { %1230 = vmatprep.mubr.msk.f32.mxu1 %vm1399_vm0, %v1400_v4  ;;  %v345_v16 = vmax.f32 %v1669_v12, 0.0  ;;  %v1775_v20 = vld [vmem:[%s1985_s4] ss:$0 sm:$0xff] }
  0xf5   :  { %v333_v21 = vmax.f32 %v230_v17, 0.0  ;;  %v343_v47 = vmax.f32 %v280_v15, 0.0 }
  0xf6   :  { %v234_v22 = vpop.f32.mrb[12].mxu0  ;;  %v299_v23 = vpop.f32.mrb[12].mxu1 }
  0xf7   :  { %v235_v24 = vadd.f32 %v1642_v45, %v234_v22  ;;  %v1152_v25 = vpop.f32.mrb[13].mxu0  ;;  %1231 = vmatmul.mubr.msk.f32.gmra.mrb[34].mxu1 %vm62_vm1, %v333_v21  ;;  %v1683_v26 = vadd.f32 %v1642_v45, %v299_v23  ;;  %v1191_v27 = vpop.f32.mrb[13].mxu1 }
  0xf8   :  { %1233 = vmatprep.mubr.msk.f32.mxu1 %vm1399_vm0, %v1400_v4 }
  0xf9   :  { %v334_v28 = vmax.f32 %v235_v24, 0.0  ;;  %v347_v59 = vmax.f32 %v1683_v26, 0.0 }
  0xfa   :  { %v239_v29 = vpop.f32.mrb[14].mxu0  ;;  %v304_v30 = vpop.f32.mrb[14].mxu1 }
  0xfb   :  { %v240_v31 = vadd.f32 %v1642_v45, %v239_v29  ;;  %v1155_v32 = vpop.f32.mrb[15].mxu0  ;;  %1234 = vmatmul.mubr.msk.f32.gmra.mrb[36].mxu1 %vm62_vm1, %v334_v28  ;;  %v1690_v33 = vadd.f32 %v1642_v45, %v304_v30  ;;  %v1194_v34 = vpop.f32.mrb[15].mxu1 }
  0xfc   :  { %1236 = vmatprep.mubr.msk.f32.mxu1 %vm1399_vm0, %v1400_v4 }
  0xfd   :  { %v335_v35 = vmax.f32 %v240_v31, 0.0  ;;  %v348_v5 = vmax.f32 %v1690_v33, 0.0 }
  0xfe   :  { %v244_v36 = vpop.f32.mrb[16].mxu0  ;;  %v309_v37 = vpop.f32.mrb[16].mxu1 }
  0xff   :  { %v245_v38 = vadd.f32 %v1642_v45, %v244_v36  ;;  %v1158_v39 = vpop.f32.mrb[17].mxu0  ;;  %1237 = vmatmul.mubr.msk.f32.gmra.mrb[38].mxu1 %vm62_vm1, %v335_v35  ;;  %v1697_v40 = vadd.f32 %v1642_v45, %v309_v37  ;;  %v1197_v41 = vpop.f32.mrb[17].mxu1 }
 0x100   :  { %1239 = vmatprep.mubr.msk.f32.mxu1 %vm1399_vm0, %v1400_v4 }
 0x101   :  { %v336_v42 = vmax.f32 %v245_v38, 0.0  ;;  %v349_v12 = vmax.f32 %v1697_v40, 0.0 }
 0x102   :  { %v249_v43 = vpop.f32.mrb[18].mxu0  ;;  %v314_v44 = vpop.f32.mrb[18].mxu1 }
 0x103   :  { %v250_v46 = vadd.f32 %v1642_v45, %v249_v43  ;;  %v1161_v48 = vpop.f32.mrb[19].mxu0  ;;  %1240 = vmatmul.mubr.msk.f32.gmra.mrb[40].mxu1 %vm62_vm1, %v336_v42  ;;  %v1704_v49 = vadd.f32 %v1642_v45, %v314_v44  ;;  %v1200_v50 = vpop.f32.mrb[19].mxu1 }
 0x104   :  { %1242 = vmatprep.mubr.msk.f32.mxu1 %vm1399_vm0, %v1400_v4 }
 0x105   :  { %v337_v51 = vmax.f32 %v250_v46, 0.0  ;;  %v350_v17 = vmax.f32 %v1704_v49, 0.0 }
 0x106   :  { %v254_v52 = vpop.f32.mrb[20].mxu0  ;;  %v319_v54 = vpop.f32.mrb[20].mxu1 }
 0x107   :  { %v255_v55 = vadd.f32 %v1642_v45, %v254_v52  ;;  %v1164_v56 = vpop.f32.mrb[21].mxu0  ;;  %1243 = vmatmul.mubr.msk.f32.gmra.mrb[42].mxu1 %vm62_vm1, %v337_v51  ;;  %v320_v57 = vadd.f32 %v1642_v45, %v319_v54  ;;  %v1203_v58 = vpop.f32.mrb[21].mxu1 }
 0x108   :  { %1245 = vmatprep.mubr.msk.f32.mxu1 %vm1399_vm0, %v1400_v4 }
 0x109   :  { %v338_v60 = vmax.f32 %v255_v55, 0.0  ;;  %v351_v18 = vmax.f32 %v320_v57, 0.0 }
 0x10a   :  { %v259_v61 = vpop.f32.mrb[22].mxu0  ;;  %v324_v62 = vpop.f32.mrb[22].mxu1 }
 0x10b   :  { %v260_v63 = vadd.f32 %v1642_v45, %v259_v61  ;;  %v1167_v0 = vpop.f32.mrb[23].mxu0  ;;  %1246 = vmatmul.mubr.msk.f32.gmra.mrb[44].mxu1 %vm62_vm1, %v338_v60  ;;  %v325_v1 = vadd.f32 %v1642_v45, %v324_v62  ;;  %v1206_v2 = vpop.f32.mrb[23].mxu1 }
 0x10c   :  { %1248 = vmatprep.mubr.msk.f32.mxu1 %vm1399_vm0, %v1400_v4 }
 0x10d   :  { %v339_v3 = vmax.f32 %v260_v63, 0.0 }
 0x10e   :  { %v264_v6 = vpop.f32.mrb[24].mxu0 }
 0x10f   :  { %v265_v7 = vadd.f32 %v1642_v45, %v264_v6  ;;  %v1170_v8 = vpop.f32.mrb[25].mxu0  ;;  %1249 = vmatmul.mubr.msk.f32.gmra.mrb[46].mxu1 %vm62_vm1, %v339_v3  ;;  %v346_v45 = vmax.f32 %v1676_v19, 0.0  ;;  %v352_v19 = vmax.f32 %v325_v1, 0.0 }
 0x110   :  { %1251 = vmatprep.mubr.msk.f32.mxu1 %vm1399_vm0, %v1400_v4 }
 0x111   :  { %v340_v10 = vmax.f32 %v265_v7, 0.0 }
 0x113   :  { %1252 = vmatmul.mubr.msk.f32.gmra.mrb[48].mxu1 %vm62_vm1, %v340_v10 }
 0x114   :  { %1254 = vmatprep.mubr.msk.f32.mxu1 %vm1399_vm0, %v1400_v4 }
 0x117   :  { %1255 = vmatmul.mubr.msk.f32.gmra.mrb[50].mxu1 %vm62_vm1, %v341_v11 }
 0x118   :  { %1257 = vmatprep.mubr.msk.f32.mxu1 %vm1399_vm0, %v1400_v4 }
 0x11b   :  { %1258 = vmatmul.mubr.msk.f32.gmra.mrb[52].mxu1 %vm62_vm1, %v342_v14 }
 0x11c   :  { %1260 = vmatprep.mubr.msk.f32.mxu1 %vm1399_vm0, %v1400_v4 }
 0x11f   :  { %1261 = vmatmul.mubr.msk.f32.gmra.mrb[54].mxu1 %vm62_vm1, %v343_v47 }
 0x120   :  { %1263 = vmatprep.mubr.msk.f32.mxu1 %vm1399_vm0, %v1400_v4 }
 0x123   :  { %1264 = vmatmul.mubr.msk.f32.gmra.mrb[56].mxu1 %vm62_vm1, %v344_v53 }
 0x124   :  { %1266 = vmatprep.mubr.msk.f32.mxu1 %vm1399_vm0, %v1400_v4 }
 0x127   :  { %1267 = vmatmul.mubr.msk.f32.gmra.mrb[58].mxu1 %vm62_vm1, %v345_v16 }
 0x128   :  { %1269 = vmatprep.mubr.msk.f32.mxu1 %vm1399_vm0, %v1400_v4 }
 0x12b   :  { %1270 = vmatmul.mubr.msk.f32.gmra.mrb[60].mxu1 %vm62_vm1, %v346_v45 }
 0x12c   :  { %1272 = vmatprep.mubr.msk.f32.mxu1 %vm1399_vm0, %v1400_v4 }
 0x12f   :  { %1273 = vmatmul.mubr.msk.f32.gmra.mrb[62].mxu1 %vm62_vm1, %v347_v59 }
 0x130   :  { %1275 = vmatprep.mubr.msk.f32.mxu1 %vm1399_vm0, %v1400_v4 }
 0x133   :  { %1276 = vmatmul.mubr.msk.f32.gmra.mrb[64].mxu1 %vm62_vm1, %v348_v5 }
 0x134   :  { %1278 = vmatprep.mubr.msk.f32.mxu1 %vm1399_vm0, %v1400_v4 }
 0x137   :  { %1279 = vmatmul.mubr.msk.f32.gmra.mrb[66].mxu1 %vm62_vm1, %v349_v12 }
 0x138   :  { %1281 = vmatprep.mubr.msk.f32.mxu1 %vm1399_vm0, %v1400_v4 }
 0x13b   :  { %1282 = vmatmul.mubr.msk.f32.gmra.mrb[68].mxu1 %vm62_vm1, %v350_v17 }
 0x13c   :  { %1284 = vmatprep.mubr.msk.f32.mxu1 %vm1399_vm0, %v1400_v4 }
 0x13f   :  { %1285 = vmatmul.mubr.msk.f32.gmra.mrb[70].mxu1 %vm62_vm1, %v351_v18 }
 0x140   :  { %1287 = vmatprep.mubr.msk.f32.mxu1 %vm1399_vm0, %v1400_v4 }
 0x143   :  { %1288 = vmatmul.mubr.msk.f32.gmra.mrb[72].mxu1 %vm62_vm1, %v352_v19 }
 0x1b6   :  { %v505_v21 = vpop.f32.mrb[24].mxu1 }
 0x1b7   :  { %v506_v22 = vadd.f32 %v1775_v20, %v505_v21  ;;  %v1217_v23 = vpop.f32.mrb[25].mxu1 }
 0x1b9   :  { %v629_v24 = vmax.f32 %v506_v22, 0.0 }
 0x1ba   :  { %v510_v25 = vpop.f32.mrb[26].mxu1 }
 0x1bb   :  { %v511_v26 = vadd.f32 %v1775_v20, %v510_v25  ;;  %v1220_v27 = vpop.f32.mrb[27].mxu1  ;;  %1299 = vmatmul.mubr.msk.f32.vlgmr.msra.gmra.mrb[26].mxu0 %vm62_vm1, %v629_v24 }
 0x1bc   :  { %1301 = vmatprep.mubr.msk.f32.mxu0 %vm1399_vm0, %v1400_v4 }
 0x1bd   :  { %v630_v28 = vmax.f32 %v511_v26, 0.0 }
 0x1be   :  { %v515_v29 = vpop.f32.mrb[28].mxu1 }
 0x1bf   :  { %v516_v30 = vadd.f32 %v1775_v20, %v515_v29  ;;  %v1223_v31 = vpop.f32.mrb[29].mxu1  ;;  %1302 = vmatmul.mubr.msk.f32.gmra.mrb[28].mxu0 %vm62_vm1, %v630_v28 }
 0x1c0   :  { %1304 = vmatprep.mubr.msk.f32.mxu0 %vm1399_vm0, %v1400_v4 }
 0x1c1   :  { %v631_v32 = vmax.f32 %v516_v30, 0.0 }
 0x1c2   :  { %v520_v33 = vpop.f32.mrb[30].mxu1 }
 0x1c3   :  { %v521_v34 = vadd.f32 %v1775_v20, %v520_v33  ;;  %v1226_v35 = vpop.f32.mrb[31].mxu1  ;;  %1305 = vmatmul.mubr.msk.f32.gmra.mrb[30].mxu0 %vm62_vm1, %v631_v32 }
 0x1c4   :  { %1307 = vmatprep.mubr.msk.f32.mxu0 %vm1399_vm0, %v1400_v4 }
 0x1c5   :  { %v632_v36 = vmax.f32 %v521_v34, 0.0 }
 0x1c6   :  { %v525_v37 = vpop.f32.mrb[32].mxu1 }
 0x1c7   :  { %v526_v38 = vadd.f32 %v1775_v20, %v525_v37  ;;  %v1229_v39 = vpop.f32.mrb[33].mxu1  ;;  %1308 = vmatmul.mubr.msk.f32.gmra.mrb[32].mxu0 %vm62_vm1, %v632_v36 }
 0x1c8   :  { %1310 = vmatprep.mubr.msk.f32.mxu0 %vm1399_vm0, %v1400_v4 }
 0x1c9   :  { %v633_v40 = vmax.f32 %v526_v38, 0.0 }
 0x1ca   :  { %v530_v41 = vpop.f32.mrb[34].mxu1 }
 0x1cb   :  { %v531_v42 = vadd.f32 %v1775_v20, %v530_v41  ;;  %v1232_v43 = vpop.f32.mrb[35].mxu1  ;;  %1311 = vmatmul.mubr.msk.f32.gmra.mrb[34].mxu0 %vm62_vm1, %v633_v40 }
 0x1cc   :  { %1313 = vmatprep.mubr.msk.f32.mxu0 %vm1399_vm0, %v1400_v4 }
 0x1cd   :  { %v634_v44 = vmax.f32 %v531_v42, 0.0 }
 0x1ce   :  { %v535_v46 = vpop.f32.mrb[36].mxu1 }
 0x1cf   :  { %v536_v48 = vadd.f32 %v1775_v20, %v535_v46  ;;  %v1235_v49 = vpop.f32.mrb[37].mxu1  ;;  %1314 = vmatmul.mubr.msk.f32.gmra.mrb[36].mxu0 %vm62_vm1, %v634_v44 }
 0x1d0   :  { %1316 = vmatprep.mubr.msk.f32.mxu0 %vm1399_vm0, %v1400_v4 }
 0x1d1   :  { %v635_v50 = vmax.f32 %v536_v48, 0.0 }
 0x1d2   :  { %v540_v51 = vpop.f32.mrb[38].mxu1 }
 0x1d3   :  { %v541_v52 = vadd.f32 %v1775_v20, %v540_v51  ;;  %v1238_v54 = vpop.f32.mrb[39].mxu1  ;;  %1317 = vmatmul.mubr.msk.f32.gmra.mrb[38].mxu0 %vm62_vm1, %v635_v50 }
 0x1d4   :  { %1319 = vmatprep.mubr.msk.f32.mxu0 %vm1399_vm0, %v1400_v4 }
 0x1d5   :  { %v636_v55 = vmax.f32 %v541_v52, 0.0 }
 0x1d6   :  { %v545_v56 = vpop.f32.mrb[40].mxu1 }
 0x1d7   :  { %v546_v57 = vadd.f32 %v1775_v20, %v545_v56  ;;  %v1241_v58 = vpop.f32.mrb[41].mxu1  ;;  %1320 = vmatmul.mubr.msk.f32.gmra.mrb[40].mxu0 %vm62_vm1, %v636_v55 }
 0x1d8   :  { %1322 = vmatprep.mubr.msk.f32.mxu0 %vm1399_vm0, %v1400_v4 }
 0x1d9   :  { %v637_v60 = vmax.f32 %v546_v57, 0.0 }
 0x1da   :  { %v550_v61 = vpop.f32.mrb[42].mxu1 }
 0x1db   :  { %v551_v62 = vadd.f32 %v1775_v20, %v550_v61  ;;  %v1244_v63 = vpop.f32.mrb[43].mxu1  ;;  %1323 = vmatmul.mubr.msk.f32.gmra.mrb[42].mxu0 %vm62_vm1, %v637_v60 }
 0x1dc   :  { %1325 = vmatprep.mubr.msk.f32.mxu0 %vm1399_vm0, %v1400_v4  ;;  %v1878_v63 = vld [vmem:[%s1986_s6] ss:$0 sm:$0xff] }
 0x1dd   :  { %v638_v0 = vmax.f32 %v551_v62, 0.0 }
 0x1de   :  { %v555_v1 = vpop.f32.mrb[44].mxu1 }
 0x1df   :  { %v556_v2 = vadd.f32 %v1775_v20, %v555_v1  ;;  %v1247_v3 = vpop.f32.mrb[45].mxu1  ;;  %1326 = vmatmul.mubr.msk.f32.gmra.mrb[44].mxu0 %vm62_vm1, %v638_v0 }
 0x1e0   :  { %1328 = vmatprep.mubr.msk.f32.mxu0 %vm1399_vm0, %v1400_v4 }
 0x1e1   :  { %v639_v6 = vmax.f32 %v556_v2, 0.0 }
 0x1e2   :  { %v560_v7 = vpop.f32.mrb[46].mxu1 }
 0x1e3   :  { %v561_v8 = vadd.f32 %v1775_v20, %v560_v7  ;;  %v1250_v9 = vpop.f32.mrb[47].mxu1  ;;  %1329 = vmatmul.mubr.msk.f32.gmra.mrb[46].mxu0 %vm62_vm1, %v639_v6 }
 0x1e4   :  { %1331 = vmatprep.mubr.msk.f32.mxu0 %vm1399_vm0, %v1400_v4 }
 0x1e5   :  { %v640_v10 = vmax.f32 %v561_v8, 0.0 }
 0x1e6   :  { %v565_v11 = vpop.f32.mrb[48].mxu1 }
 0x1e7   :  { %v566_v13 = vadd.f32 %v1775_v20, %v565_v11  ;;  %v1253_v14 = vpop.f32.mrb[49].mxu1  ;;  %1332 = vmatmul.mubr.msk.f32.gmra.mrb[48].mxu0 %vm62_vm1, %v640_v10 }
 0x1e8   :  { %1334 = vmatprep.mubr.msk.f32.mxu0 %vm1399_vm0, %v1400_v4 }
 0x1e9   :  { %v641_v15 = vmax.f32 %v566_v13, 0.0 }
 0x1ea   :  { %v570_v47 = vpop.f32.mrb[50].mxu1 }
 0x1eb   :  { %v571_v53 = vadd.f32 %v1775_v20, %v570_v47  ;;  %v1256_v16 = vpop.f32.mrb[51].mxu1  ;;  %1335 = vmatmul.mubr.msk.f32.gmra.mrb[50].mxu0 %vm62_vm1, %v641_v15 }
 0x1ec   :  { %1337 = vmatprep.mubr.msk.f32.mxu0 %vm1399_vm0, %v1400_v4 }
 0x1ed   :  { %v642_v45 = vmax.f32 %v571_v53, 0.0 }
 0x1ee   :  { %v575_v59 = vpop.f32.mrb[52].mxu1 }
 0x1ef   :  { %v576_v5 = vadd.f32 %v1775_v20, %v575_v59  ;;  %v1259_v12 = vpop.f32.mrb[53].mxu1  ;;  %1338 = vmatmul.mubr.msk.f32.gmra.mrb[52].mxu0 %vm62_vm1, %v642_v45 }
 0x1f0   :  { %1340 = vmatprep.mubr.msk.f32.mxu0 %vm1399_vm0, %v1400_v4 }
 0x1f1   :  { %v643_v17 = vmax.f32 %v576_v5, 0.0 }
 0x1f2   :  { %v580_v18 = vpop.f32.mrb[54].mxu1 }
 0x1f3   :  { %v581_v19 = vadd.f32 %v1775_v20, %v580_v18  ;;  %v1262_v21 = vpop.f32.mrb[55].mxu1  ;;  %1341 = vmatmul.mubr.msk.f32.gmra.mrb[54].mxu0 %vm62_vm1, %v643_v17 }
 0x1f4   :  { %1343 = vmatprep.mubr.msk.f32.mxu0 %vm1399_vm0, %v1400_v4 }
 0x1f5   :  { %v644_v22 = vmax.f32 %v581_v19, 0.0 }
 0x1f6   :  { %v585_v23 = vpop.f32.mrb[56].mxu1 }
 0x1f7   :  { %v586_v24 = vadd.f32 %v1775_v20, %v585_v23  ;;  %v1265_v25 = vpop.f32.mrb[57].mxu1  ;;  %1344 = vmatmul.mubr.msk.f32.gmra.mrb[56].mxu0 %vm62_vm1, %v644_v22 }
 0x1f8   :  { %1346 = vmatprep.mubr.msk.f32.mxu0 %vm1399_vm0, %v1400_v4 }
 0x1f9   :  { %v645_v26 = vmax.f32 %v586_v24, 0.0 }
 0x1fa   :  { %v590_v27 = vpop.f32.mrb[58].mxu1 }
 0x1fb   :  { %v591_v28 = vadd.f32 %v1775_v20, %v590_v27  ;;  %v1268_v29 = vpop.f32.mrb[59].mxu1  ;;  %1347 = vmatmul.mubr.msk.f32.gmra.mrb[58].mxu0 %vm62_vm1, %v645_v26 }
 0x1fc   :  { %1349 = vmatprep.mubr.msk.f32.mxu0 %vm1399_vm0, %v1400_v4 }
 0x1fd   :  { %v646_v30 = vmax.f32 %v591_v28, 0.0 }
 0x1fe   :  { %v595_v31 = vpop.f32.mrb[60].mxu1 }
 0x1ff   :  { %v596_v32 = vadd.f32 %v1775_v20, %v595_v31  ;;  %v1271_v33 = vpop.f32.mrb[61].mxu1  ;;  %1350 = vmatmul.mubr.msk.f32.gmra.mrb[60].mxu0 %vm62_vm1, %v646_v30 }
 0x200   :  { %1352 = vmatprep.mubr.msk.f32.mxu0 %vm1399_vm0, %v1400_v4 }
 0x201   :  { %v647_v34 = vmax.f32 %v596_v32, 0.0 }
 0x202   :  { %v600_v35 = vpop.f32.mrb[62].mxu1 }
 0x203   :  { %v601_v36 = vadd.f32 %v1775_v20, %v600_v35  ;;  %v1274_v37 = vpop.f32.mrb[63].mxu1  ;;  %1353 = vmatmul.mubr.msk.f32.gmra.mrb[62].mxu0 %vm62_vm1, %v647_v34 }
 0x204   :  { %1355 = vmatprep.mubr.msk.f32.mxu0 %vm1399_vm0, %v1400_v4 }
 0x205   :  { %v648_v38 = vmax.f32 %v601_v36, 0.0 }
 0x206   :  { %v605_v39 = vpop.f32.mrb[64].mxu1 }
 0x207   :  { %v606_v40 = vadd.f32 %v1775_v20, %v605_v39  ;;  %v1277_v41 = vpop.f32.mrb[65].mxu1  ;;  %1356 = vmatmul.mubr.msk.f32.gmra.mrb[64].mxu0 %vm62_vm1, %v648_v38 }
 0x208   :  { %1358 = vmatprep.mubr.msk.f32.mxu0 %vm1399_vm0, %v1400_v4 }
 0x209   :  { %v649_v42 = vmax.f32 %v606_v40, 0.0 }
 0x20a   :  { %v610_v43 = vpop.f32.mrb[66].mxu1 }
 0x20b   :  { %v611_v44 = vadd.f32 %v1775_v20, %v610_v43  ;;  %v1280_v46 = vpop.f32.mrb[67].mxu1  ;;  %1359 = vmatmul.mubr.msk.f32.gmra.mrb[66].mxu0 %vm62_vm1, %v649_v42 }
 0x20c   :  { %1361 = vmatprep.mubr.msk.f32.mxu0 %vm1399_vm0, %v1400_v4 }
 0x20d   :  { %v650_v48 = vmax.f32 %v611_v44, 0.0 }
 0x20e   :  { %v615_v49 = vpop.f32.mrb[68].mxu1 }
 0x20f   :  { %v616_v50 = vadd.f32 %v1775_v20, %v615_v49  ;;  %v1283_v51 = vpop.f32.mrb[69].mxu1  ;;  %1362 = vmatmul.mubr.msk.f32.gmra.mrb[68].mxu0 %vm62_vm1, %v650_v48 }
 0x210   :  { %1364 = vmatprep.mubr.msk.f32.mxu0 %vm1399_vm0, %v1400_v4 }
 0x211   :  { %v651_v52 = vmax.f32 %v616_v50, 0.0 }
 0x212   :  { %v620_v54 = vpop.f32.mrb[70].mxu1 }
 0x213   :  { %v621_v55 = vadd.f32 %v1775_v20, %v620_v54  ;;  %v1286_v56 = vpop.f32.mrb[71].mxu1  ;;  %1365 = vmatmul.mubr.msk.f32.gmra.mrb[70].mxu0 %vm62_vm1, %v651_v52 }
 0x214   :  { %1367 = vmatprep.mubr.msk.f32.mxu0 %vm1399_vm0, %v1400_v4 }
 0x215   :  { %v652_v57 = vmax.f32 %v621_v55, 0.0 }
 0x216   :  { %v625_v58 = vpop.f32.mrb[72].mxu1 }
 0x217   :  { %v626_v60 = vadd.f32 %v1775_v20, %v625_v58  ;;  %v1289_v61 = vpop.f32.mrb[73].mxu1  ;;  %1368 = vmatmul.mubr.msk.f32.gmra.mrb[72].mxu0 %vm62_vm1, %v652_v57 }
 0x218   :  { %1370 = vmatprep.mubr.msk.f32.mxu0 %vm1399_vm0, %v1400_v4 }
 0x219   :  { %v653_v62 = vmax.f32 %v626_v60, 0.0 }
 0x21b   :  { %1371 = vmatmul.mubr.msk.f32.gmra.mrb[74].mxu0 %vm62_vm1, %v653_v62 }
 0x28e   :  { %v806_v0 = vpop.f32.mrb[26].mxu0 }
 0x28f   :  { %v807_v1 = vadd.f32 %v1878_v63, %v806_v0  ;;  %v1300_v2 = vpop.f32.mrb[27].mxu0 }
 0x291   :  { %930 = vst [vmem:[%s1987_s7] sm:$0xff] %v807_v1 }
 0x292   :  { %v811_v20 = vpop.f32.mrb[28].mxu0 }
 0x293   :  { %v812_v3 = vadd.f32 %v1878_v63, %v811_v20  ;;  %v1303_v4 = vpop.f32.mrb[29].mxu0 }
 0x295   :  { %931 = vst [vmem:[%s1987_s7 + $0x8] sm:$0xff] %v812_v3 }
 0x296   :  { %v816_v6 = vpop.f32.mrb[30].mxu0 }
 0x297   :  { %v817_v7 = vadd.f32 %v1878_v63, %v816_v6  ;;  %v1306_v8 = vpop.f32.mrb[31].mxu0 }
 0x299   :  { %932 = vst [vmem:[%s1987_s7 + $0x10] sm:$0xff] %v817_v7 }
 0x29a   :  { %v821_v9 = vpop.f32.mrb[32].mxu0 }
 0x29b   :  { %v822_v10 = vadd.f32 %v1878_v63, %v821_v9  ;;  %v1309_v11 = vpop.f32.mrb[33].mxu0 }
 0x29d   :  { %933 = vst [vmem:[%s1987_s7 + $0x18] sm:$0xff] %v822_v10 }
 0x29e   :  { %v826_v13 = vpop.f32.mrb[34].mxu0 }
 0x29f   :  { %v827_v14 = vadd.f32 %v1878_v63, %v826_v13  ;;  %v1312_v15 = vpop.f32.mrb[35].mxu0 }
 0x2a1   :  { %934 = vst [vmem:[%s1987_s7 + $0x20] sm:$0xff] %v827_v14 }
 0x2a2   :  { %v831_v47 = vpop.f32.mrb[36].mxu0 }
 0x2a3   :  { %v832_v53 = vadd.f32 %v1878_v63, %v831_v47  ;;  %v1315_v16 = vpop.f32.mrb[37].mxu0 }
 0x2a5   :  { %935 = vst [vmem:[%s1987_s7 + $0x28] sm:$0xff] %v832_v53 }
 0x2a6   :  { %v836_v45 = vpop.f32.mrb[38].mxu0 }
 0x2a7   :  { %v837_v59 = vadd.f32 %v1878_v63, %v836_v45  ;;  %v1318_v5 = vpop.f32.mrb[39].mxu0 }
 0x2a9   :  { %936 = vst [vmem:[%s1987_s7 + $0x30] sm:$0xff] %v837_v59 }
 0x2aa   :  { %v841_v12 = vpop.f32.mrb[40].mxu0 }
 0x2ab   :  { %v842_v17 = vadd.f32 %v1878_v63, %v841_v12  ;;  %v1321_v18 = vpop.f32.mrb[41].mxu0 }
 0x2ad   :  { %937 = vst [vmem:[%s1987_s7 + $0x38] sm:$0xff] %v842_v17 }
 0x2ae   :  { %v846_v19 = vpop.f32.mrb[42].mxu0 }
 0x2af   :  { %v847_v21 = vadd.f32 %v1878_v63, %v846_v19  ;;  %v1324_v22 = vpop.f32.mrb[43].mxu0 }
 0x2b1   :  { %938 = vst [vmem:[%s1987_s7 + $0x40] sm:$0xff] %v847_v21 }
 0x2b2   :  { %v851_v23 = vpop.f32.mrb[44].mxu0 }
 0x2b3   :  { %v852_v24 = vadd.f32 %v1878_v63, %v851_v23  ;;  %v1327_v25 = vpop.f32.mrb[45].mxu0 }
 0x2b5   :  { %939 = vst [vmem:[%s1987_s7 + $0x48] sm:$0xff] %v852_v24 }
 0x2b6   :  { %v856_v26 = vpop.f32.mrb[46].mxu0 }
 0x2b7   :  { %v857_v27 = vadd.f32 %v1878_v63, %v856_v26  ;;  %v1330_v28 = vpop.f32.mrb[47].mxu0 }
 0x2b9   :  { %940 = vst [vmem:[%s1987_s7 + $0x50] sm:$0xff] %v857_v27 }
 0x2ba   :  { %v861_v29 = vpop.f32.mrb[48].mxu0 }
 0x2bb   :  { %v862_v30 = vadd.f32 %v1878_v63, %v861_v29  ;;  %v1333_v31 = vpop.f32.mrb[49].mxu0 }
 0x2bd   :  { %941 = vst [vmem:[%s1987_s7 + $0x58] sm:$0xff] %v862_v30 }
 0x2be   :  { %v866_v32 = vpop.f32.mrb[50].mxu0 }
 0x2bf   :  { %v867_v33 = vadd.f32 %v1878_v63, %v866_v32  ;;  %v1336_v34 = vpop.f32.mrb[51].mxu0 }
 0x2c1   :  { %942 = vst [vmem:[%s1987_s7 + $0x60] sm:$0xff] %v867_v33 }
 0x2c2   :  { %v871_v35 = vpop.f32.mrb[52].mxu0 }
 0x2c3   :  { %v872_v36 = vadd.f32 %v1878_v63, %v871_v35  ;;  %v1339_v37 = vpop.f32.mrb[53].mxu0 }
 0x2c5   :  { %943 = vst [vmem:[%s1987_s7 + $0x68] sm:$0xff] %v872_v36 }
 0x2c6   :  { %v876_v38 = vpop.f32.mrb[54].mxu0 }
 0x2c7   :  { %v877_v39 = vadd.f32 %v1878_v63, %v876_v38  ;;  %v1342_v40 = vpop.f32.mrb[55].mxu0 }
 0x2c9   :  { %944 = vst [vmem:[%s1987_s7 + $0x70] sm:$0xff] %v877_v39 }
 0x2ca   :  { %v881_v41 = vpop.f32.mrb[56].mxu0 }
 0x2cb   :  { %v882_v42 = vadd.f32 %v1878_v63, %v881_v41  ;;  %v1345_v43 = vpop.f32.mrb[57].mxu0 }
 0x2cd   :  { %945 = vst [vmem:[%s1987_s7 + $0x78] sm:$0xff] %v882_v42 }
 0x2ce   :  { %v886_v44 = vpop.f32.mrb[58].mxu0 }
 0x2cf   :  { %v887_v46 = vadd.f32 %v1878_v63, %v886_v44  ;;  %v1348_v48 = vpop.f32.mrb[59].mxu0 }
 0x2d1   :  { %946 = vst [vmem:[%s1987_s7 + $0x80] sm:$0xff] %v887_v46 }
 0x2d2   :  { %v891_v49 = vpop.f32.mrb[60].mxu0 }
 0x2d3   :  { %v892_v50 = vadd.f32 %v1878_v63, %v891_v49  ;;  %v1351_v51 = vpop.f32.mrb[61].mxu0 }
 0x2d5   :  { %947 = vst [vmem:[%s1987_s7 + $0x88] sm:$0xff] %v892_v50 }
 0x2d6   :  { %v896_v52 = vpop.f32.mrb[62].mxu0 }
 0x2d7   :  { %v897_v54 = vadd.f32 %v1878_v63, %v896_v52  ;;  %v1354_v55 = vpop.f32.mrb[63].mxu0 }
 0x2d9   :  { %948 = vst [vmem:[%s1987_s7 + $0x90] sm:$0xff] %v897_v54 }
 0x2da   :  { %v901_v56 = vpop.f32.mrb[64].mxu0 }
 0x2db   :  { %v902_v57 = vadd.f32 %v1878_v63, %v901_v56  ;;  %v1357_v58 = vpop.f32.mrb[65].mxu0 }
 0x2dd   :  { %949 = vst [vmem:[%s1987_s7 + $0x98] sm:$0xff] %v902_v57 }
 0x2de   :  { %v906_v60 = vpop.f32.mrb[66].mxu0 }
 0x2df   :  { %v907_v61 = vadd.f32 %v1878_v63, %v906_v60  ;;  %v1360_v62 = vpop.f32.mrb[67].mxu0 }
 0x2e1   :  { %950 = vst [vmem:[%s1987_s7 + $0xa0] sm:$0xff] %v907_v61 }
 0x2e2   :  { %v911_v0 = vpop.f32.mrb[68].mxu0 }
 0x2e3   :  { %v912_v1 = vadd.f32 %v1878_v63, %v911_v0  ;;  %v1363_v2 = vpop.f32.mrb[69].mxu0 }
 0x2e5   :  { %951 = vst [vmem:[%s1987_s7 + $0xa8] sm:$0xff] %v912_v1 }
 0x2e6   :  { %v916_v20 = vpop.f32.mrb[70].mxu0 }
 0x2e7   :  { %v917_v3 = vadd.f32 %v1878_v63, %v916_v20  ;;  %v1366_v4 = vpop.f32.mrb[71].mxu0 }
 0x2e9   :  { %952 = vst [vmem:[%s1987_s7 + $0xb0] sm:$0xff] %v917_v3 }
 0x2ea   :  { %v921_v6 = vpop.f32.mrb[72].mxu0 }
 0x2eb   :  { %v922_v7 = vadd.f32 %v1878_v63, %v921_v6  ;;  %v1369_v8 = vpop.f32.mrb[73].mxu0 }
 0x2ed   :  { %953 = vst [vmem:[%s1987_s7 + $0xb8] sm:$0xff] %v922_v7 }
 0x2ee   :  { %v926_v9 = vpop.f32.mrb[74].mxu0 }
 0x2ef   :  { %v927_v10 = vadd.f32 %v1878_v63, %v926_v9  ;;  %v1372_v11 = vpop.f32.mrb[75].mxu0 }
 0x2f1   :  { %954 = vst [vmem:[%s1987_s7 + $0xc0] sm:$0xff] %v927_v10 }

</bundles_post_ra>
